<compile_context>
chip_gen: v7x
topology: tpu7x:2x2x1
jax: 0.10.0
libtpu: 0.0.40
codegen_flags: <defaults>
</compile_context>

<pallas_src>
import functools

import jax
import jax.numpy as jnp
from jax.experimental import pallas as pl
from jax.experimental.pallas import tpu as pltpu

_SMOOTH = 1.0        # self.smooth = 1 in the PyTorch module
_ONE_HOT_EPS = 1e-6  # tgm.losses.one_hot default eps (added to the one-hot map)
_LANE = 128


def _iou_loss_kernel(x_ref, t_ref, o_ref, acc_ref, *, hw_valid, hw_tile):
    # x_ref:   (1, C, T) logits tile of one batch element (f32 or bf16)
    # t_ref:   (1, 1, T) int32 class labels tile
    # o_ref:   (1, 1, 128) f32 per-batch loss, lane-broadcast (written on last tile)
    # acc_ref: (1, 1) f32 running intersection accumulator (VMEM scratch)
    hw_id = pl.program_id(1)
    n_hw = pl.num_programs(1)

    @pl.when(hw_id == 0)
    def _init():
        acc_ref[...] = jnp.zeros_like(acc_ref)

    x = x_ref[0].astype(jnp.float32)            # (C, T)
    t = t_ref[0]                                # (1, T) int32
    C, T = x.shape

    # softmax denominator over the channel (sublane) axis
    m = jnp.max(x, axis=0, keepdims=True)       # (1, T)
    e = jnp.exp(x - m)                          # (C, T)
    denom = jnp.sum(e, axis=0, keepdims=True)   # (1, T)
    inv = pl.reciprocal(denom, approx=False)    # (1, T)

    # probability the softmax assigns to each pixel's target class
    ch = jax.lax.broadcasted_iota(jnp.int32, (C, T), 0)
    e_tgt = jnp.sum(jnp.where(ch == t, e, 0.0), axis=0, keepdims=True)  # (1, T)
    p_tgt = e_tgt * inv                                                 # (1, T)

    # mask lanes beyond the true (unpadded) spatial extent
    if hw_valid % hw_tile != 0:  # trace-time constant: padding exists
        lane = hw_id * T + jax.lax.broadcasted_iota(jnp.int32, (1, T), 1)
        p_tgt = jnp.where(lane < hw_valid, p_tgt, 0.0)

    acc_ref[...] += jnp.sum(p_tgt, axis=1, keepdims=True)

    @pl.when(hw_id == n_hw - 1)
    def _finalize():
        intersection = acc_ref[...] + jnp.float32(_ONE_HOT_EPS * hw_valid)   # (1, 1)
        cardinality = jnp.float32((2.0 + C * _ONE_HOT_EPS) * hw_valid)
        union = cardinality - intersection
        iou = (intersection + _SMOOTH) / (union + _SMOOTH)
        loss = 1.0 - iou                                                     # (1, 1)
        o_ref[...] = jnp.broadcast_to(loss[None], (1, 1, _LANE))


def _device_kind():
    try:
        return jax.devices()[0].device_kind.lower()
    except Exception:
        return ""


def _hw_tile_and_vmem_limit(C, itemsize, hw):
    """Generation-aware spatial tile size + scoped-VMEM limit."""
    kind = _device_kind()
    if ("v5 lite" in kind) or ("v5e" in kind):
        budget = 4 << 20     # v5e: 16 MiB default scoped VMEM, ~0.8 TB/s HBM
        cap = 96 << 20
    elif "v7" in kind:
        budget = 10 << 20    # v7x: only 64 MiB physical VMEM per core
        cap = 40 << 20
    else:
        budget = 16 << 20    # v6e / default: 128 MiB physical VMEM
        cap = 96 << 20
    per_lane = C * itemsize + 4                      # logits column + int32 target
    hw_lane = pl.cdiv(hw, _LANE) * _LANE
    tile = max(_LANE, min((budget // per_lane) // _LANE * _LANE, hw_lane))
    step_bytes = tile * per_lane + _LANE * 4
    vmem_limit = int(min(cap, max(32 << 20, 3 * step_bytes)))
    return int(tile), vmem_limit


def iou_loss(inputs, targets):
    """inputs: (B, C, H, W) float logits; targets: (B, H, W) int class map.

    Returns per-sample loss of shape (B,), matching the PyTorch module
    (1 - IoU with the sums reduced over dims (1, 2, 3))."""
    if inputs.ndim != 4:
        raise ValueError(f"Invalid input shape, expected BxCxHxW, got {inputs.shape}")
    if inputs.shape[-2:] != targets.shape[-2:]:
        raise ValueError("input and target spatial shapes must match")

    B, C, H, W = inputs.shape
    HW = H * W

    # Keep the dominant HBM stream narrow: bf16 logits stay bf16 (cast to f32
    # in-kernel, hidden under DMA); other dtypes are computed in f32.
    if inputs.dtype not in (jnp.float32, jnp.bfloat16):
        inputs = inputs.astype(jnp.float32)
    x = inputs.reshape(B, C, HW)
    t = targets.reshape(B, 1, HW).astype(jnp.int32)

    tile, vmem_limit = _hw_tile_and_vmem_limit(C, x.dtype.itemsize, HW)
    hw_padded = pl.cdiv(HW, tile) * tile
    if hw_padded != HW:
        pad = hw_padded - HW
        x = jnp.pad(x, ((0, 0), (0, 0), (0, pad)))
        t = jnp.pad(t, ((0, 0), (0, 0), (0, pad)))
    n_hw = hw_padded // tile

    kernel = functools.partial(_iou_loss_kernel, hw_valid=HW, hw_tile=tile)

    cost = pl.CostEstimate(
        flops=int(6 * B * C * HW),
        transcendentals=int(B * C * HW),
        bytes_accessed=int(B * C * HW * x.dtype.itemsize + B * HW * 4 + B * _LANE * 4),
    )

    # TODO(synk): on v7x with B == 1, additionally bisect HW into two parallel
    # halves (partial-sum outputs combined in the wrapper) so both TCs work.
    out = pl.pallas_call(
        kernel,
        out_shape=jax.ShapeDtypeStruct((B, 1, _LANE), jnp.float32),
        grid=(B, n_hw),
        in_specs=[
            pl.BlockSpec((1, C, tile), lambda b, h: (b, 0, h)),
            pl.BlockSpec((1, 1, tile), lambda b, h: (b, 0, h)),
        ],
        out_specs=pl.BlockSpec((1, 1, _LANE), lambda b, h: (b, 0, 0)),
        scratch_shapes=[pltpu.VMEM((1, 1), jnp.float32)],
        compiler_params=pltpu.CompilerParams(
            dimension_semantics=("parallel", "arbitrary"),
            vmem_limit_bytes=vmem_limit,
        ),
        cost_estimate=cost,
    )(x, t)
    return out[:, 0, 0]


def _reference_iou_loss(inputs, targets):
    # pure-JAX reference mirroring the PyTorch forward
    soft = jax.nn.softmax(inputs.astype(jnp.float32), axis=1)
    oh = jax.nn.one_hot(targets, inputs.shape[1], axis=1, dtype=jnp.float32) + _ONE_HOT_EPS
    inter = jnp.sum(soft * oh, axis=(1, 2, 3))
    card = jnp.sum(soft + oh, axis=(1, 2, 3))
    union = card - inter
    return 1.0 - (inter + _SMOOTH) / (union + _SMOOTH)


if __name__ == "__main__":
    B, C, H, W = 2, 4, 16, 16
    key = jax.random.PRNGKey(0)
    k_in, k_tgt = jax.random.split(key)
    inputs = jax.random.normal(k_in, (B, C, H, W), dtype=jnp.float32)
    targets = jax.random.randint(k_tgt, (B, H, W), 0, C, dtype=jnp.int32)

    loss = iou_loss(inputs, targets)
    loss = jax.block_until_ready(loss)

    ref = _reference_iou_loss(inputs, targets)
    assert loss.shape == (B,)
    assert jnp.allclose(loss, ref, atol=1e-5, rtol=1e-5), (loss, ref)
    print("KERNEL_OK")
</pallas_src>

<mosaic_0001>
module attributes {stable_mosaic.version = 11 : i64} {
  func.func @_iou_loss_kernel(%arg0: i32, %arg1: i32, %arg2: memref<1x4x256xf32, #tpu.memory_space<vmem>>, %arg3: memref<1x1x256xi32, #tpu.memory_space<vmem>>, %arg4: memref<1x1x128xf32, #tpu.memory_space<vmem>>, %arg5: memref<1x1xf32, #tpu.memory_space<vmem>>) attributes {dimension_semantics = [#tpu.dimension_semantics<parallel>, #tpu.dimension_semantics<arbitrary>], iteration_bounds = array<i64: 2, 1>, scalar_prefetch = 0 : i64, scratch_operands = 1 : i64, tpu.core_type = #tpu.core_type<tc>, window_params = [{transform_indices = @transform_0, window_bounds = array<i64: 1, 4, 256>}, {transform_indices = @transform_1, window_bounds = array<i64: 1, 1, 256>}, {transform_indices = @transform_2, window_bounds = array<i64: 1, 1, 128>}]} {
    %c0_i32 = arith.constant 0 : i32
    %0 = arith.cmpi eq, %arg1, %c0_i32 : i32
    %1 = arith.extui %0 : i1 to i32
    %c0_i32_0 = arith.constant 0 : i32
    %2 = arith.cmpi ne, %1, %c0_i32_0 : i32
    scf.if %2 {
      %cst_16 = arith.constant 0.000000e+00 : f32
      %31 = vector.broadcast %cst_16 : f32 to vector<1x1xf32>
      %c0_17 = arith.constant 0 : index
      %c0_18 = arith.constant 0 : index
      %32 = vector.load %arg5[%c0_17, %c0_18] : memref<1x1xf32, #tpu.memory_space<vmem>>, vector<1x1xf32>
      tpu.vector_store %arg5[%c0_17, %c0_18], %31 {strides = array<i32>} : memref<1x1xf32, #tpu.memory_space<vmem>>, vector<1x1xf32>,
    } else {
    }
    %c0 = arith.constant 0 : index
    %c0_1 = arith.constant 0 : index
    %c0_2 = arith.constant 0 : index
    %3 = vector.load %arg2[%c0, %c0_1, %c0_2] : memref<1x4x256xf32, #tpu.memory_space<vmem>>, vector<1x4x256xf32>
    %4 = vector.shape_cast %3 : vector<1x4x256xf32> to vector<4x256xf32>
    %c0_3 = arith.constant 0 : index
    %c0_4 = arith.constant 0 : index
    %c0_5 = arith.constant 0 : index
    %5 = vector.load %arg3[%c0_3, %c0_4, %c0_5] : memref<1x1x256xi32, #tpu.memory_space<vmem>>, vector<1x1x256xi32>
    %6 = vector.shape_cast %5 : vector<1x1x256xi32> to vector<1x256xi32>
    %cst = arith.constant dense<0xFF800000> : vector<256xf32>
    %7 = vector.multi_reduction <maximumf>, %4, %cst [0] : vector<4x256xf32> to vector<256xf32>
    %8 = vector.shape_cast %7 : vector<256xf32> to vector<1x256xf32>
    %9 = vector.broadcast %8 : vector<1x256xf32> to vector<4x256xf32>
    %10 = arith.subf %4, %9 : vector<4x256xf32>
    %11 = math.exp %10 : vector<4x256xf32>
    %cst_6 = arith.constant dense<0.000000e+00> : vector<256xf32>
    %12 = vector.multi_reduction <add>, %11, %cst_6 [0] : vector<4x256xf32> to vector<256xf32>
    %13 = vector.shape_cast %12 : vector<256xf32> to vector<1x256xf32>
    %14 = tpu.reciprocal %13 : vector<1x256xf32> -> vector<1x256xf32>
    %15 = tpu.iota {dimensions = array<i32: 0>} : vector<4x256xi32>
    %16 = vector.broadcast %6 : vector<1x256xi32> to vector<4x256xi32>
    %17 = arith.cmpi eq, %15, %16 : vector<4x256xi32>
    %cst_7 = arith.constant 0.000000e+00 : f32
    %18 = vector.broadcast %cst_7 : f32 to vector<4x256xf32>
    %19 = arith.select %17, %11, %18 : vector<4x256xi1>, vector<4x256xf32>
    %cst_8 = arith.constant dense<0.000000e+00> : vector<256xf32>
    %20 = vector.multi_reduction <add>, %19, %cst_8 [0] : vector<4x256xf32> to vector<256xf32>
    %21 = vector.shape_cast %20 : vector<256xf32> to vector<1x256xf32>
    %22 = arith.mulf %21, %14 : vector<1x256xf32>
    %c0_9 = arith.constant 0 : index
    %c0_10 = arith.constant 0 : index
    %23 = vector.load %arg5[%c0_9, %c0_10] : memref<1x1xf32, #tpu.memory_space<vmem>>, vector<1x1xf32>
    %cst_11 = arith.constant dense<0.000000e+00> : vector<1xf32>
    %24 = vector.multi_reduction <add>, %22, %cst_11 [1] : vector<1x256xf32> to vector<1xf32>
    %25 = vector.shape_cast %24 : vector<1xf32> to vector<1x1xf32>
    %26 = arith.addf %23, %25 : vector<1x1xf32>
    %c0_12 = arith.constant 0 : index
    %c0_13 = arith.constant 0 : index
    %27 = vector.load %arg5[%c0_12, %c0_13] : memref<1x1xf32, #tpu.memory_space<vmem>>, vector<1x1xf32>
    tpu.vector_store %arg5[%c0_12, %c0_13], %26 {strides = array<i32>} : memref<1x1xf32, #tpu.memory_space<vmem>>, vector<1x1xf32>,
    %c0_i32_14 = arith.constant 0 : i32
    %28 = arith.cmpi eq, %arg1, %c0_i32_14 : i32
    %29 = arith.extui %28 : i1 to i32
    %c0_i32_15 = arith.constant 0 : i32
    %30 = arith.cmpi ne, %29, %c0_i32_15 : i32
    scf.if %30 {
      %c0_16 = arith.constant 0 : index
      %c0_17 = arith.constant 0 : index
      %31 = vector.load %arg5[%c0_16, %c0_17] : memref<1x1xf32, #tpu.memory_space<vmem>>, vector<1x1xf32>
      %cst_18 = arith.constant 2.560000e-04 : f32
      %32 = vector.broadcast %cst_18 : f32 to vector<1x1xf32>
      %33 = arith.addf %31, %32 : vector<1x1xf32>
      %cst_19 = arith.constant 512.001038 : f32
      %34 = vector.broadcast %cst_19 : f32 to vector<1x1xf32>
      %35 = arith.subf %34, %33 : vector<1x1xf32>
      %cst_20 = arith.constant 1.000000e+00 : f32
      %36 = vector.broadcast %cst_20 : f32 to vector<1x1xf32>
      %37 = arith.addf %33, %36 : vector<1x1xf32>
      %cst_21 = arith.constant 1.000000e+00 : f32
      %38 = vector.broadcast %cst_21 : f32 to vector<1x1xf32>
      %39 = arith.addf %35, %38 : vector<1x1xf32>
      %40 = arith.divf %37, %39 : vector<1x1xf32>
      %cst_22 = arith.constant 1.000000e+00 : f32
      %41 = vector.broadcast %cst_22 : f32 to vector<1x1xf32>
      %42 = arith.subf %41, %40 : vector<1x1xf32>
      %43 = vector.shape_cast %42 : vector<1x1xf32> to vector<1x1x1xf32>
      %44 = vector.shape_cast %43 : vector<1x1x1xf32> to vector<1x1x1xf32>
      %45 = vector.broadcast %44 : vector<1x1x1xf32> to vector<1x1x128xf32>
      %c0_23 = arith.constant 0 : index
      %c0_24 = arith.constant 0 : index
      %c0_25 = arith.constant 0 : index
      %46 = vector.load %arg4[%c0_23, %c0_24, %c0_25] : memref<1x1x128xf32, #tpu.memory_space<vmem>>, vector<1x1x128xf32>
      tpu.vector_store %arg4[%c0_23, %c0_24, %c0_25], %45 {strides = array<i32>} : memref<1x1x128xf32, #tpu.memory_space<vmem>>, vector<1x1x128xf32>,
    } else {
    }
    return
  }
  func.func @transform_0(%arg0: i32, %arg1: i32) -> (i32, i32, i32) {
    %c0_i32 = arith.constant 0 : i32
    %c0_i32_0 = arith.constant 0 : i32
    return %arg0, %c0_i32, %arg1 : i32, i32, i32
  }
  func.func @transform_1(%arg0: i32, %arg1: i32) -> (i32, i32, i32) {
    %c0_i32 = arith.constant 0 : i32
    %c0_i32_0 = arith.constant 0 : i32
    return %arg0, %c0_i32, %arg1 : i32, i32, i32
  }
  func.func @transform_2(%arg0: i32, %arg1: i32) -> (i32, i32, i32) {
    %c0_i32 = arith.constant 0 : i32
    %c0_i32_0 = arith.constant 0 : i32
    %c0_i32_1 = arith.constant 0 : i32
    return %arg0, %c0_i32, %c0_i32_0 : i32, i32, i32
  }
}

</mosaic_0001>

<bundles_post_ra>
// kernel: tpu_custom_call.1
= control target key start
LH: loop header
LB: loop body
LE: loop exit
PB: predicated region body
PF: predicated region fallthrough
CT: control target
= control target key end

     0   :  { %7 = vsyncpa [#allocation4], 0  ;;  %s944_s0 = inlined_call_operand.hbm [shape: f32[2,4,256], index: 0, kind: input, shape index: {}]   ;;  %s945_s1 = inlined_call_operand.hbm [shape: s32[2,1,256], index: 1, kind: input, shape index: {}]   ;;  %s946_s2 = inlined_call_operand.hbm [shape: f32[2,1,128], index: 2, kind: output, shape index: {}]  }
   0x1   :  { %9 = vsyncpa [#allocation4 + $0x1], 0 }
   0x2   :  { %10 = vsyncpa [#allocation7], 0 }
   0x3   :  { %12 = vsyncpa [#allocation7 + $0x1], 0 }
   0x4   :  { %13 = vsyncpa [#allocation5], 0 }
   0x5   :  { %15 = vsyncpa [#allocation5 + $0x1], 0  ;;  %s710_s9 = smov 0   ;;  %s712_s10 = smov 0  }
   0x6   :  { %s714_s11 = smov 0   ;;  %s716_s12 = smov 0  }
   0x7   :  { %s718_s13 = smov 0   ;;  %s720_s14 = smov 0  }
   0x8 LB: > { %s445_s15 = sadd.s32 4294967295, %s688_s14   ;;  %s446_s16 = sadd.s32 4294967294, %s688_s14   ;;  %s688_s14 = sphi %s720_s14, %s21_s14   ;;  %s684_s13 = sphi %s718_s13, %s966_s13   ;;  %s680_s12 = sphi %s716_s12, %s965_s12   ;;  %s676_s11 = sphi %s714_s11, %s964_s11   ;;  %s672_s10 = sphi %s712_s10, %s963_s10   ;;  %s668_s9 = sphi %s710_s9, %s962_s9  }
   0x9   : > { %s33_s17 = sadd.s32 1, %s684_s13  ;;  %s42_s18 = sadd.s32 1, %s676_s11 }
   0xa   : > { %p35_p0 = scmp.ge.s32.totalorder %s33_s17, 2  ;;  %p49_p1 = scmp.ne.s32.totalorder %s676_s11, %s672_s10 }
   0xb   : > { %p50_p2 = scmp.eq.s32.totalorder %s688_s14, 0  ;;  %p55_p3 = scmp.ne.s32.totalorder %s672_s10, %s668_s9 }
   0xc   : > { %s968_s17 = smov (%p35_p0, %s33_s17), 0  ;;  %p56_p5 = scmp.eq.s32.totalorder %s445_s15, 0 }
   0xd   : > { %p751_p4 = por %p50_p2, %p49_p1  ;;  %s37_s20 = ssub.s32 %s684_s13, %s968_s17 }
   0xe   : > { %p107_p6 = scmp.eq.s32.totalorder %s445_s15, 1  ;;  %p40_p7 = scmp.eq.s32.totalorder %s37_s20, 0 }
   0xf   : > { %p757_p8 = por %p56_p5, %p55_p3  ;;  %p113_p10 = scmp.eq.s32.totalorder %s446_s16, 1 }
  0x10   : > { %p761_p9 = por %p107_p6, %p49_p1  ;;  %p480_p13 = scmp.lt.s32.totalorder %s688_s14, 2 }
  0x11   : > { %s950_s21 = scalar_select %p757_p8, 1, 0 }
  0x12   : > { %s951_s22 = scalar_select %p761_p9, 1, 0 }
  0x13   : > { %s766_s23 = scalar_select %p40_p7, %s676_s11, %s42_s18  }
  0x14   : > { %p768_p11 = por %p113_p10, %p55_p3  ;;  %s775_s25 = sand.u32 1, %s676_s11  }
  0x15   : > { %s449_s26 = sshll.u32 %s775_s25, 3  ;;  %s461_s27 = sshll.u32 %s684_s13, 7 }
  0x16   : > { %s952_s24 = scalar_select %p768_p11, 1, 0 }
  0x17   : > { %s782_s30 = scalar_lea.hbm %s944_s0, %s461_s27  ;;  %s137_s3 = scalar_lea.vmem [#allocation3], %s449_s26 }
  0x18   : > { %s147_s4 = sshll.u32 %s137_s3, 4  ;;  %p788_p0 = pnand %p480_p13, %p751_p4  ;;  %s784_s4 = int_to_ptr.vmem [resolvable:$true] %s147_s4 }
  0x19   : > { %s134_s6 = scalar_lea.sflag [#allocation4], %s775_s25  ;;  %s542_s7 = scalar_lea.hbm %s782_s30, 128 }
  0x1a   : > { %p543_p3 = scmp.ne.s32.totalorder %s782_s30, %s542_s7  ;;  %p544_p5 = pneg %p788_p0 }
  0x1b   : > { %s547_s16 = scalar_lea.hbm %s944_s0, 256  ;;  %p548_p4 = scmp.lt.u32.totalorder %s782_s30, %s944_s0 }
  0x1c   : > { %p545_p6 = pnand %p544_p5, %p543_p3  ;;  %p549_p10 = scmp.lt.u32.totalorder %s547_s16, %s542_s7 }
  0x1d   : > { %p551_p12 = scmp.lt.u32.totalorder %s542_s7, %s782_s30 }
  0x1e   : > { %p546_p7 = pneg %p545_p6  ;;  %p550_p13 = por %p549_p10, %p548_p4 }
  0x20   : > { %p552_p1 = por %p551_p12, %p550_p13 }
  0x22   : > { %p553_p2 = pnand %p552_p1, %p546_p7 }
  0x24   : > { %556 = shalt.err (!%p553_p2)
}
  0x25   : > { %s557_s20 = scalar_lea.vmem %s784_s4, 128  ;;  %s690_s26 = smov [#allocation3]  }
  0x26   : > { %p558_p3 = scmp.ne.s32.totalorder %s784_s4, %s557_s20  ;;  %s562_s27 = sshll.u32 %s690_s26, 4  ;;  %s563_s27 = int_to_ptr.vmem [resolvable:$false] %s562_s27 }
  0x27   : > { %s564_s28 = scalar_lea.vmem %s563_s27, 256  ;;  %p565_p9 = scmp.lt.s32.totalorder %s784_s4, %s563_s27 }
  0x28   : > { %p560_p6 = pnand %p558_p3, %p544_p5  ;;  %p566_p4 = scmp.lt.s32.totalorder %s564_s28, %s557_s20 }
  0x2a   : > { %p561_p11 = pneg %p560_p6  ;;  %p567_p10 = por %p566_p4, %p565_p9 }
  0x2c   : > { %p568_p12 = pnand %p567_p10, %p561_p11 }
  0x2e   : > { %571 = shalt.err (!%p568_p12)
}
  0x2f   : > { %472 = dma.hbm_to_vmem [thread:$0]  (!%p788_p0), %s782_s30, 128, %s784_s4, %s134_s6  }
  0x30   : > { %p954_p1 = scmp.lt.s32.totalorder %s688_s14, 3  ;;  %p955_p2 = scmp.ge.s32.totalorder %s688_s14, 1 }
  0x31   : > { %s452_s3 = sshll.u32 %s775_s25, 1  ;;  %s462_s7 = sshll.u32 %s684_s13, 5 }
  0x32   : > { %p824_p7 = pnand %p955_p2, %p954_p1  ;;  %s833_s16 = scalar_lea.hbm %s945_s1, %s462_s7 }
  0x33   : > { %s158_s18 = scalar_lea.vmem [#allocation6], %s452_s3  ;;  %s155_s30 = scalar_lea.sflag [#allocation7], %s775_s25 }
  0x34   : > { %s956_s29 = scalar_select %p824_p7, 1, 0 }
  0x35   : > { %s168_s19 = sshll.u32 %s158_s18, 4  ;;  %s572_s4 = scalar_lea.hbm %s833_s16, 32  ;;  %s169_s19 = int_to_ptr.vmem [resolvable:$true] %s168_s19 }
  0x36   : > { %p573_p9 = scmp.ne.s32.totalorder %s833_s16, %s572_s4  ;;  %s577_s26 = scalar_lea.hbm %s945_s1, 64 }
  0x37   : > { %p578_p3 = scmp.lt.u32.totalorder %s833_s16, %s945_s1  ;;  %p579_p6 = scmp.lt.u32.totalorder %s577_s26, %s572_s4 }
  0x38   : > { %p575_p11 = pnand %p573_p9, %p544_p5  ;;  %p581_p10 = scmp.lt.u32.totalorder %s572_s4, %s833_s16 }
  0x39   : > { %p580_p4 = por %p579_p6, %p578_p3 }
  0x3a   : > { %p576_p13 = pneg %p575_p11 }
  0x3b   : > { %p582_p12 = por %p581_p10, %p580_p4 }
  0x3d   : > { %p583_p1 = pnand %p582_p12, %p576_p13 }
  0x3f   : > { %586 = shalt.err (!%p583_p1)
}
  0x40   : > { %s587_s25 = scalar_lea.vmem %s169_s19, 32  ;;  %s691_s3 = smov [#allocation6]  }
  0x41   : > { %p588_p2 = scmp.ne.s32.totalorder %s169_s19, %s587_s25  ;;  %s592_s7 = sshll.u32 %s691_s3, 4  ;;  %s593_s7 = int_to_ptr.vmem [resolvable:$false] %s592_s7 }
  0x42   : > { %s594_s8 = scalar_lea.vmem %s593_s7, 64  ;;  %p595_p8 = scmp.lt.s32.totalorder %s169_s19, %s593_s7 }
  0x43   : > { %p590_p9 = pnand %p588_p2, %p544_p5  ;;  %p596_p7 = scmp.lt.s32.totalorder %s594_s8, %s587_s25 }
  0x45   : > { %p591_p11 = pneg %p590_p9  ;;  %p597_p3 = por %p596_p7, %p595_p8 }
  0x47   : > { %p598_p6 = pnand %p597_p3, %p591_p11 }
  0x49   : > { %601 = shalt.err (!%p598_p6)
}
  0x4a   : > { %475 = dma.hbm_to_vmem [thread:$0]  (!%p788_p0), %s833_s16, 32, %s169_s19, %s155_s30  }
  0x4b   : > { %p957_p13 = scmp.ne.s32.totalorder %s956_s29, 0 }
  0x4c   : > { %s858_s15 = sand.u32 (!%p957_p13), 1, %s672_s10   ;;  %p958_p5 = scmp.ne.s32.totalorder (!%p957_p13), %s950_s21, 0 }
  0x4d   : > { %177 = sbr.rel (%p957_p13) target bundleno = 468 (0x1d4), region = 28  ;;  %s456_s18 = sshll.u32 (!%p957_p13), %s858_s15, 3 }
  0x4e   : > { %s180_s4 = scalar_lea.sflag (!%p957_p13), [#allocation4], %s858_s15  ;;  %s183_s6 = scalar_lea.vmem (!%p957_p13), [#allocation3], %s456_s18 }
  0x54   : > { %655 = dma.done.wait (%p958_p5), %s180_s4, 128  }
  0x55   : > { %657 = vsyncadd (%p958_p5), %s180_s4, 4294967168  ;;  %s457_s5 = sshll.u32 %s858_s15, 1  ;;  %s189_s29 = scalar_lea.sflag [#allocation7], %s858_s15 }
  0x56   : > { %s192_s16 = scalar_lea.vmem [#allocation6], %s457_s5 }
  0x57   : > { %659 = dma.done.wait (%p958_p5), %s189_s29, 32  }
  0x58   : > { %661 = vsyncadd (%p958_p5), %s189_s29, 4294967264  ;;  %vm223_vm0 = vcmask 0   ;;  %v692_v0 = vmov 0.0   ;;  %vm230_vm1 = vcmask 1043456   ;;  %v225_v1 = vld [vmem:[%s183_s6] sm:$0xff]  ;;  %v271_v17 = vlaneseq  ;;  %s458_s21 = sshll.u32 %s680_s12, 4 }
  0x59   : > { %224 = vst.msk [vmem:[#allocation2] sm:$0x1] %vm223_vm0, %v692_v0  ;;  %v228_v2 = vcombine.high %v225_v1, %v225_v1  ;;  %v231_v3 = vsel %vm230_vm1, %v225_v1, -inf  ;;  %v226_v23 = vld [vmem:[%s192_s16] sm:$0x3]  ;;  %v693_v0 = vmov 0   ;;  %s895_s27 = scalar_lea.hbm %s946_s2, %s458_s21 }
  0x5a   : > { %v232_v4 = vrot.slane %v231_v3, 4  ;;  %v875_v20 = vshrl.u32 %v271_v17, 7  ;;  %532 = vset.pattern.permute.xlu0 %v693_v0  ;;  %s216_s19 = scalar_lea.vmem [#allocation8], %s858_s15  ;;  %s330_s28 = scalar_lea.sflag [#allocation5], %s858_s15 }
  0x5b   : > { %v238_v5 = vsel %vm230_vm1, %v228_v2, -inf  ;;  %s342_s30 = sshll.u32 %s216_s19, 4  ;;  %p959_p0 = scmp.ne.s32.totalorder %s951_s22, 0  ;;  %s897_s30 = int_to_ptr.vmem [resolvable:$true] %s342_s30 }
  0x5c   : > { %v233_v6 = vmax.f32 %v231_v3, %v232_v4  ;;  %v239_v7 = vrot.slane %v238_v5, 4  ;;  %v275_v22 = vsub.s32 0, %v875_v20  ;;  %v279_v24 = vsub.s32 1, %v875_v20  ;;  %s602_s25 = scalar_lea.vmem %s897_s30, 16  ;;  %s694_s12 = smov [#allocation8]  }
  0x5d   : > { %p603_p8 = scmp.ne.s32.totalorder %s897_s30, %s602_s25  ;;  %s606_s3 = sshll.u32 %s694_s12, 4  ;;  %s607_s3 = int_to_ptr.vmem [resolvable:$false] %s606_s3 }
  0x5e   : > { %v234_v8 = vrot.slane %v233_v6, 2  ;;  %v240_v9 = vmax.f32 %v238_v5, %v239_v7  ;;  %v276_v25 = vrot.slane %v226_v23, %v275_v22  ;;  %v280_v26 = vrot.slane %v226_v23, %v279_v24  ;;  %s608_s7 = scalar_lea.vmem %s607_s3, 32  ;;  %p609_p10 = scmp.lt.s32.totalorder %s897_s30, %s607_s3 }
  0x5f   : > { %p604_p7 = pnand %p603_p8, %p959_p0  ;;  %p610_p12 = scmp.lt.s32.totalorder %s608_s7, %s602_s25 }
  0x60   : > { %v235_v10 = vmax.f32 %v233_v6, %v234_v8  ;;  %v241_v11 = vrot.slane %v240_v9, 2  ;;  %vm281_vm2 = vcmp.eq.s32.totalorder %v875_v20, %v276_v25  ;;  %vm282_vm3 = vcmp.eq.s32.totalorder %v875_v20, %v280_v26 }
  0x61   : > { %p605_p4 = pneg %p604_p7  ;;  %p611_p1 = por %p610_p12, %p609_p10 }
  0x62   : > { %v236_v12 = vrot.slane %v235_v10, 1  ;;  %v242_v13 = vmax.f32 %v240_v9, %v241_v11 }
  0x63   : > { %p612_p2 = pnand %p611_p1, %p605_p4 }
  0x64   : > { %v237_v14 = vmax.f32 %v235_v10, %v236_v12  ;;  %v243_v15 = vrot.slane %v242_v13, 1 }
  0x66   : > { %v244_v16 = vmax.f32 %v242_v13, %v243_v15 }
  0x68   : > { %v247_v18 = vcombine.low %v237_v14, %v244_v16 }
  0x6a   : > { %v249_v19 = vsub.f32 %v225_v1, %v247_v18  ;;  %v301_v1 = vld [vmem:[#allocation2] sm:$0x1] }
  0x6c   : > { %v250_v21 = vmul.f32 1.442695, %v249_v19 }
  0x6e   : > { %534 = vpow2.f32 %v250_v21 }
  0x78   : > { %v535_v27 = vpop.eup %534 }
  0x79   : > { %v253_v28 = vcombine.high %v535_v27, %v535_v27  ;;  %v255_v29 = vsel %vm230_vm1, %v535_v27, 0.0  ;;  %v283_v30 = vsel %vm281_vm2, %v535_v27, 0.0 }
  0x7a   : > { %v256_v31 = vrot.slane %v255_v29, 4  ;;  %v285_v32 = vsel %vm230_vm1, %v283_v30, 0.0 }
  0x7b   : > { %v262_v33 = vsel %vm230_vm1, %v253_v28, 0.0  ;;  %v284_v34 = vsel %vm282_vm3, %v253_v28, 0.0  ;;  %v286_v35 = vrot.slane %v285_v32, 4 }
  0x7c   : > { %v257_v36 = vadd.f32 %v256_v31, %v255_v29  ;;  %v263_v37 = vrot.slane %v262_v33, 4  ;;  %v292_v38 = vsel %vm230_vm1, %v284_v34, 0.0 }
  0x7d   : > { %v287_v39 = vadd.f32 %v286_v35, %v285_v32  ;;  %v293_v40 = vrot.slane %v292_v38, 4 }
  0x7e   : > { %v258_v41 = vrot.slane %v257_v36, 2  ;;  %v264_v42 = vadd.f32 %v263_v37, %v262_v33 }
  0x7f   : > { %v294_v43 = vadd.f32 %v293_v40, %v292_v38  ;;  %v288_v46 = vrot.slane %v287_v39, 2 }
  0x80   : > { %v259_v44 = vadd.f32 %v258_v41, %v257_v36  ;;  %v265_v45 = vrot.slane %v264_v42, 2 }
  0x81   : > { %v295_v49 = vrot.slane %v294_v43, 2  ;;  %v289_v52 = vadd.f32 %v288_v46, %v287_v39 }
  0x82   : > { %v260_v47 = vrot.slane %v259_v44, 1  ;;  %v266_v48 = vadd.f32 %v265_v45, %v264_v42 }
  0x83   : > { %v296_v54 = vadd.f32 %v295_v49, %v294_v43  ;;  %v290_v55 = vrot.slane %v289_v52, 1 }
  0x84   : > { %v261_v50 = vadd.f32 %v260_v47, %v259_v44  ;;  %v267_v51 = vrot.slane %v266_v48, 1 }
  0x85   : > { %v297_v56 = vrot.slane %v296_v54, 1  ;;  %v291_v57 = vadd.f32 %v290_v55, %v289_v52 }
  0x86   : > { %v268_v53 = vadd.f32 %v267_v51, %v266_v48  ;;  %536 = vrcp.f32 %v261_v50 }
  0x87   : > { %v298_v58 = vadd.f32 %v297_v56, %v296_v54 }
  0x88   : > { %538 = vrcp.f32 %v268_v53 }
  0x90   : > { %v537_v59 = vpop.eup %536 }
  0x91   : > { %v299_v60 = vmul.f32 %v537_v59, %v291_v57 }
  0x92   : > { %v539_v61 = vpop.eup %538 }
  0x93   : > { %v300_v62 = vmul.f32 %v539_v61, %v298_v58 }
  0x95   : > { %v302_v63 = vadd.f32 %v300_v62, %v299_v60 }
  0x97   : > { %303 = vadd.xlane.f32.xlu0 %v302_v63 }
 0x124   : > { %v304_v2 = vpop.xlane.xlu0 %303 }
 0x125   : > { %v305_v3 = vadd.f32 %v304_v2, %v301_v1 }
 0x127   : > { %307 = vst.msk [vmem:[#allocation2] sm:$0x1] %vm223_vm0, %v305_v3 }
 0x12e   : > { %v311_v4 = vld [vmem:[#allocation2] sm:$0x1] }
 0x12f   : > { %v312_v5 = vadd.f32 0.000256, %v311_v4 }
 0x131   : > { %v313_v6 = vsub.f32 512.00104, %v312_v5  ;;  %v314_v8 = vadd.f32 1.0, %v312_v5 }
 0x133   : > { %v315_v7 = vadd.f32 1.0, %v313_v6 }
 0x135   : > { %540 = vrcp.f32 %v315_v7 }
 0x13f   : > { %v541_v9 = vpop.eup %540 }
 0x140   : > { %v317_v10 = vmul.f32 %v541_v9, %v314_v8 }
 0x142   : > { %v318_v11 = vsub.f32 1.0, %v317_v10 }
 0x144   : > { %321 = vperm.xlu0 %532, %v318_v11  }
 0x1c3   : > { %v322_v12 = vpop.permute.xlu0 %321 }
 0x1c4   : > { %v327_v13 = vrot.slane %v322_v12, %v275_v22 }
 0x1c6   : > { %328 = vst [vmem:[%s216_s19] sm:$0x1] %v327_v13 }
 0x1c7   : > { %615 = shalt.err (!%p612_p2)
}
 0x1c8   : > { %s616_s8 = scalar_lea.hbm %s895_s27, 16  ;;  %s620_s4 = scalar_lea.hbm %s946_s2, 32 }
 0x1c9   : > { %p617_p9 = scmp.ne.s32.totalorder %s895_s27, %s616_s8  ;;  %p621_p6 = scmp.lt.u32.totalorder %s895_s27, %s946_s2 }
 0x1ca   : > { %p622_p13 = scmp.lt.u32.totalorder %s620_s4, %s616_s8  ;;  %p624_p8 = scmp.lt.u32.totalorder %s616_s8, %s895_s27 }
 0x1cb   : > { %p618_p11 = pnand %p617_p9, %p959_p0 }
 0x1cc   : > { %p623_p5 = por %p622_p13, %p621_p6 }
 0x1cd   : > { %p619_p3 = pneg %p618_p11 }
 0x1ce   : > { %p625_p7 = por %p624_p8, %p623_p5 }
 0x1d0   : > { %p626_p4 = pnand %p625_p7, %p619_p3 }
 0x1d2   : > { %629 = shalt.err (!%p626_p4)
}
 0x1d3   : > { %467 = dma.vmem_to_hbm [thread:$0]  (%p959_p0), %s897_s30, 16, %s895_s27, %s330_s28  }
 0x1d4 PF: > { %s354_s29 = sand.u32 1, %s668_s9   ;;  %p960_p10 = scmp.ne.s32.totalorder %s952_s24, 0 }
 0x1d5   : > { %p961_p12 = scmp.ge.s32.totalorder %s688_s14, 2  ;;  %s355_s16 = scalar_lea.sflag [#allocation5], %s354_s29 }
 0x1d7   : > { %p477_p1 = pnand %p961_p12, %p960_p10 }
 0x1d9   : > { %663 = dma.done.wait (!%p477_p1), %s355_s16, 16  }
 0x1da   : > { %665 = vsyncadd (!%p477_p1), %s355_s16, 4294967280  ;;  %s21_s14 = sadd.s32 1, %s688_s14   ;;  %s962_s9 = smov %s672_s10 }
 0x1db   : > { %p18_p2 = scmp.ge.s32.totalorder %s21_s14, 4   ;;  %s963_s10 = smov %s676_s11 }
 0x1dc   : > { %s964_s11 = smov %s766_s23  ;;  %s965_s12 = smov %s684_s13 }
 0x1dd   : > { %s966_s13 = smov %s968_s17  ;;  %20 = sbr.rel (!%p18_p2) target bundleno = 8 (0x8), region = 94 }
 0x1e4   :  { %359 = vsyncpa [#allocation4], 1 }
 0x1e5   :  { %361 = vsyncpa [#allocation4 + $0x1], 1 }
 0x1e6   :  { %362 = vsyncpa [#allocation7], 1 }
 0x1e7   :  { %364 = vsyncpa [#allocation7 + $0x1], 1 }
 0x1e8   :  { %365 = vsyncpa [#allocation5], 1 }
 0x1e9   :  { %367 = vsyncpa [#allocation5 + $0x1], 1 }

</bundles_post_ra>
